<compile_context>
chip_gen: v6e
topology: v6e:2x2x1
jax: 0.10.0
libtpu: 0.0.40
codegen_flags: <defaults>
</compile_context>

<pallas_src>
import functools

import jax
import jax.numpy as jnp
from jax.experimental import pallas as pl
from jax.experimental.pallas import tpu as pltpu


_VMEM_LIMIT_BYTES = 32 * 1024 * 1024  # safe on v5e/v6e (128 MiB) and v7x (64 MiB)


def _pick_spatial_tile(C, S, dtype_bytes):
    """Pick a lane (last-dim) tile that evenly divides S.

    Aims for ~2 MiB per (1, C, tile) block and prefers multiples of 128
    (lane-dense, unmasked stores).  Falls back to the full extent (always a
    legal block shape) if no lane-aligned divisor exists.
    """
    target_elems = (2 * 1024 * 1024) // max(dtype_bytes, 1)
    target = max(128, target_elems // max(C, 1))
    if S <= target:
        return S
    t = (min(target, S) // 128) * 128
    while t >= 128:
        if S % t == 0:
            return t
        t -= 128
    return S  # no lane-aligned divisor: single full-extent tile


# ---------------------------------------------------------------------------
# Stage 1: per-sample channel sums (tiled reduction over the spatial axis).
# ---------------------------------------------------------------------------
def _channel_sum_kernel(x_ref, sum_ref):
    t = pl.program_id(1)

    @pl.when(t == 0)
    def _():
        sum_ref[...] = jnp.zeros_like(sum_ref)

    x = x_ref[...].astype(jnp.float32)                       # (1, C, S_tile)
    sum_ref[...] += jnp.sum(x, axis=-1, keepdims=True)       # (1, C, 1)


def _channel_sum(x3):
    """x3: (B, C, S) -> f32 per-sample channel sums of shape (B, C, 1)."""
    B, C, S = x3.shape
    st = _pick_spatial_tile(C, S, x3.dtype.itemsize)
    nt = S // st
    nbytes = x3.size * x3.dtype.itemsize
    return pl.pallas_call(
        _channel_sum_kernel,
        out_shape=jax.ShapeDtypeStruct((B, C, 1), jnp.float32),
        grid=(B, nt),
        in_specs=[pl.BlockSpec((1, C, st), lambda b, t: (b, 0, t))],
        out_specs=pl.BlockSpec((1, C, 1), lambda b, t: (b, 0, 0)),
        compiler_params=pltpu.CompilerParams(
            dimension_semantics=("parallel", "arbitrary"),
            vmem_limit_bytes=_VMEM_LIMIT_BYTES),
        cost_estimate=pl.CostEstimate(
            flops=B * C * S, transcendentals=0,
            bytes_accessed=nbytes + B * C * 4),
    )(x3)


# ---------------------------------------------------------------------------
# Stage 2: tiny gate computation (fc_squeeze -> ReLU -> fc_* -> sigmoid).
# ---------------------------------------------------------------------------
def _gate_kernel(inv_sv, inv_ss,
                 sumv_ref, sums_ref,
                 wsqv_ref, wsqs_ref, bsq_ref,
                 wv_ref, bv_ref, ws_ref, bs_ref,
                 gv_ref, gs_ref):
    sq_v = sumv_ref[...][:, :, 0] * inv_sv                    # (B, Cv) f32
    sq_s = sums_ref[...][:, :, 0] * inv_ss                    # (B, Cs) f32

    exc = (jnp.dot(sq_v, wsqv_ref[...].astype(jnp.float32),
                   preferred_element_type=jnp.float32)
           + jnp.dot(sq_s, wsqs_ref[...].astype(jnp.float32),
                     preferred_element_type=jnp.float32)
           + bsq_ref[...].astype(jnp.float32))                # (B, dim_out)
    exc = jnp.maximum(exc, 0.0)

    gv = jax.nn.sigmoid(jnp.dot(exc, wv_ref[...].astype(jnp.float32),
                                preferred_element_type=jnp.float32)
                        + bv_ref[...].astype(jnp.float32))    # (B, Cv)
    gs = jax.nn.sigmoid(jnp.dot(exc, ws_ref[...].astype(jnp.float32),
                                preferred_element_type=jnp.float32)
                        + bs_ref[...].astype(jnp.float32))    # (B, Cs)

    gv_ref[...] = gv[:, :, None]                              # (B, Cv, 1)
    gs_ref[...] = gs[:, :, None]                              # (B, Cs, 1)


def _compute_gates(sums_v, sums_s, n_sp_v, n_sp_s, params):
    (wsq_v, wsq_s, bsq, wv, bv, ws, bs) = params
    B, Cv, _ = sums_v.shape
    _, Cs, _ = sums_s.shape
    dim_out = bsq.shape[-1]
    kern = functools.partial(_gate_kernel, 1.0 / float(n_sp_v), 1.0 / float(n_sp_s))
    vmem = pl.BlockSpec(memory_space=pltpu.MemorySpace.VMEM)
    param_elems = ((Cv + Cs) * dim_out + dim_out
                   + dim_out * Cv + Cv + dim_out * Cs + Cs)
    return pl.pallas_call(
        kern,
        out_shape=(jax.ShapeDtypeStruct((B, Cv, 1), jnp.float32),
                   jax.ShapeDtypeStruct((B, Cs, 1), jnp.float32)),
        in_specs=[vmem] * 9,
        out_specs=(vmem, vmem),
        compiler_params=pltpu.CompilerParams(
            vmem_limit_bytes=_VMEM_LIMIT_BYTES),
        cost_estimate=pl.CostEstimate(
            flops=2 * B * ((Cv + Cs) * dim_out + dim_out * (Cv + Cs)),
            transcendentals=B * (Cv + Cs),
            bytes_accessed=4 * (2 * B * (Cv + Cs) + param_elems)),
    )(sums_v, sums_s, wsq_v, wsq_s, bsq, wv, bv, ws, bs)


# ---------------------------------------------------------------------------
# Stage 3: streamed broadcast multiply in the input dtype.
# ---------------------------------------------------------------------------
def _scale_kernel(x_ref, gate_ref, o_ref):
    g = gate_ref[...].astype(o_ref.dtype)                     # (1, C, 1)
    o_ref[...] = x_ref[...] * g                               # broadcast over lanes


def _scale_channels(x3, gate):
    """x3: (B, C, S), gate: (B, C, 1) f32 -> x3 * gate broadcast over S."""
    B, C, S = x3.shape
    st = _pick_spatial_tile(C, S, x3.dtype.itemsize)
    nt = S // st
    nbytes = x3.size * x3.dtype.itemsize
    # TODO(synk): for very small spatial extents (e.g. skeleton S=16) fold
    # channels into the lane axis to get fully lane-dense stores.
    return pl.pallas_call(
        _scale_kernel,
        out_shape=jax.ShapeDtypeStruct((B, C, S), x3.dtype),
        grid=(B, nt),
        in_specs=[pl.BlockSpec((1, C, st), lambda b, t: (b, 0, t)),
                  pl.BlockSpec((1, C, 1), lambda b, t: (b, 0, 0))],
        out_specs=pl.BlockSpec((1, C, st), lambda b, t: (b, 0, t)),
        compiler_params=pltpu.CompilerParams(
            dimension_semantics=("parallel", "parallel"),
            vmem_limit_bytes=_VMEM_LIMIT_BYTES),
        cost_estimate=pl.CostEstimate(
            flops=B * C * S, transcendentals=0,
            bytes_accessed=2 * nbytes + B * C * 4),
    )(x3, gate)


# ---------------------------------------------------------------------------
# Forward wrapper (semantics of the PyTorch MMTM.forward).
# ---------------------------------------------------------------------------
def mmtm_forward(visual, skeleton, params):
    """visual: (B, C_v, *spatial_v), skeleton: (B, C_s, *spatial_s)."""
    B, Cv = visual.shape[:2]
    _, Cs = skeleton.shape[:2]
    vis3 = visual.reshape(B, Cv, -1)
    sk3 = skeleton.reshape(B, Cs, -1)
    Sv = vis3.shape[-1]
    Ss = sk3.shape[-1]

    # Pass 1: per-sample channel sums (one pipelined read of each tensor).
    sums_v = _channel_sum(vis3)
    sums_s = _channel_sum(sk3)

    # Tiny gate math, once per sample (not per spatial tile).
    gate_v, gate_s = _compute_gates(sums_v, sums_s, Sv, Ss, params)

    # Pass 2: streamed gated multiply in the input dtype.
    out_v = _scale_channels(vis3, gate_v)
    out_s = _scale_channels(sk3, gate_s)

    return out_v.reshape(visual.shape), out_s.reshape(skeleton.shape)


def init_mmtm_params(key, dim_visual, dim_skeleton, ratio, dtype=jnp.float32):
    dim = dim_visual + dim_skeleton
    dim_out = int(2 * dim / ratio)
    ks = jax.random.split(key, 6)
    # nn.Linear-style weights, stored transposed (in, out) for x @ W.
    w_sq = jax.random.normal(ks[0], (dim, dim_out), dtype) * 0.1
    b_sq = jax.random.normal(ks[1], (1, dim_out), dtype) * 0.1
    w_v = jax.random.normal(ks[2], (dim_out, dim_visual), dtype) * 0.1
    b_v = jax.random.normal(ks[3], (1, dim_visual), dtype) * 0.1
    w_s = jax.random.normal(ks[4], (dim_out, dim_skeleton), dtype) * 0.1
    b_s = jax.random.normal(ks[5], (1, dim_skeleton), dtype) * 0.1
    # split fc_squeeze weight along its input dim: [visual rows; skeleton rows]
    w_sq_v = w_sq[:dim_visual]
    w_sq_s = w_sq[dim_visual:]
    return (w_sq_v, w_sq_s, b_sq, w_v, b_v, w_s, b_s)


def mmtm_reference(visual, skeleton, params):
    """Pure-JAX reference mirroring the PyTorch forward."""
    (wsq_v, wsq_s, bsq, wv, bv, ws, bs) = params
    B, Cv = visual.shape[:2]
    _, Cs = skeleton.shape[:2]
    sq_v = visual.reshape(B, Cv, -1).mean(-1)
    sq_s = skeleton.reshape(B, Cs, -1).mean(-1)
    squeeze = jnp.concatenate([sq_v, sq_s], axis=1)
    w_sq = jnp.concatenate([wsq_v, wsq_s], axis=0)
    exc = jax.nn.relu(squeeze @ w_sq + bsq)
    vg = jax.nn.sigmoid(exc @ wv + bv)
    sg = jax.nn.sigmoid(exc @ ws + bs)
    vg = vg.reshape(vg.shape + (1,) * (visual.ndim - 2))
    sg = sg.reshape(sg.shape + (1,) * (skeleton.ndim - 2))
    return visual * vg, skeleton * sg


if __name__ == "__main__":
    key = jax.random.PRNGKey(0)
    k_vis, k_sk, k_par = jax.random.split(key, 3)

    dim_visual, dim_skeleton, ratio = 4, 8, 4
    # visual: NCHW, skeleton: NCT (the module accepts any trailing dims)
    visual = jax.random.normal(k_vis, (2, dim_visual, 16, 16), jnp.float32)
    skeleton = jax.random.normal(k_sk, (2, dim_skeleton, 16), jnp.float32)

    params = init_mmtm_params(k_par, dim_visual, dim_skeleton, ratio)

    vis_out, sk_out = mmtm_forward(visual, skeleton, params)
    jax.block_until_ready((vis_out, sk_out))

    vis_ref, sk_ref = mmtm_reference(visual, skeleton, params)
    assert jnp.allclose(vis_out, vis_ref, atol=1e-5, rtol=1e-5)
    assert jnp.allclose(sk_out, sk_ref, atol=1e-5, rtol=1e-5)

    print("KERNEL_OK")
</pallas_src>

<mosaic_0001>
module attributes {stable_mosaic.version = 11 : i64} {
  func.func @_channel_sum_kernel(%arg0: i32, %arg1: i32, %arg2: memref<1x4x256xf32, #tpu.memory_space<vmem>>, %arg3: memref<1x4x1xf32, #tpu.memory_space<vmem>>) attributes {dimension_semantics = [#tpu.dimension_semantics<parallel>, #tpu.dimension_semantics<arbitrary>], iteration_bounds = array<i64: 2, 1>, scalar_prefetch = 0 : i64, scratch_operands = 0 : i64, tpu.core_type = #tpu.core_type<tc>, window_params = [{transform_indices = @transform_0, window_bounds = array<i64: 1, 4, 256>}, {transform_indices = @transform_1, window_bounds = array<i64: 1, 4, 1>}]} {
    %c0_i32 = arith.constant 0 : i32
    %0 = arith.cmpi eq, %arg1, %c0_i32 : i32
    %1 = arith.extui %0 : i1 to i32
    %c0_i32_0 = arith.constant 0 : i32
    %2 = arith.cmpi ne, %1, %c0_i32_0 : i32
    scf.if %2 {
      %cst_9 = arith.constant 0.000000e+00 : f32
      %9 = vector.broadcast %cst_9 : f32 to vector<1x4x1xf32>
      %c0_10 = arith.constant 0 : index
      %c0_11 = arith.constant 0 : index
      %c0_12 = arith.constant 0 : index
      %10 = vector.load %arg3[%c0_10, %c0_11, %c0_12] : memref<1x4x1xf32, #tpu.memory_space<vmem>>, vector<1x4x1xf32>
      tpu.vector_store %arg3[%c0_10, %c0_11, %c0_12], %9 {strides = array<i32>} : memref<1x4x1xf32, #tpu.memory_space<vmem>>, vector<1x4x1xf32>,
    } else {
    }
    %c0 = arith.constant 0 : index
    %c0_1 = arith.constant 0 : index
    %c0_2 = arith.constant 0 : index
    %3 = vector.load %arg2[%c0, %c0_1, %c0_2] : memref<1x4x256xf32, #tpu.memory_space<vmem>>, vector<1x4x256xf32>
    %c0_3 = arith.constant 0 : index
    %c0_4 = arith.constant 0 : index
    %c0_5 = arith.constant 0 : index
    %4 = vector.load %arg3[%c0_3, %c0_4, %c0_5] : memref<1x4x1xf32, #tpu.memory_space<vmem>>, vector<1x4x1xf32>
    %cst = arith.constant dense<0.000000e+00> : vector<1x4xf32>
    %5 = vector.multi_reduction <add>, %3, %cst [2] : vector<1x4x256xf32> to vector<1x4xf32>
    %6 = vector.shape_cast %5 : vector<1x4xf32> to vector<1x4x1xf32>
    %7 = arith.addf %4, %6 : vector<1x4x1xf32>
    %c0_6 = arith.constant 0 : index
    %c0_7 = arith.constant 0 : index
    %c0_8 = arith.constant 0 : index
    %8 = vector.load %arg3[%c0_6, %c0_7, %c0_8] : memref<1x4x1xf32, #tpu.memory_space<vmem>>, vector<1x4x1xf32>
    tpu.vector_store %arg3[%c0_6, %c0_7, %c0_8], %7 {strides = array<i32>} : memref<1x4x1xf32, #tpu.memory_space<vmem>>, vector<1x4x1xf32>,
    return
  }
  func.func @transform_0(%arg0: i32, %arg1: i32) -> (i32, i32, i32) {
    %c0_i32 = arith.constant 0 : i32
    %c0_i32_0 = arith.constant 0 : i32
    return %arg0, %c0_i32, %arg1 : i32, i32, i32
  }
  func.func @transform_1(%arg0: i32, %arg1: i32) -> (i32, i32, i32) {
    %c0_i32 = arith.constant 0 : i32
    %c0_i32_0 = arith.constant 0 : i32
    %c0_i32_1 = arith.constant 0 : i32
    return %arg0, %c0_i32, %c0_i32_0 : i32, i32, i32
  }
}

</mosaic_0001>

<bundles_post_ra>
// kernel: tpu_custom_call.1
= control target key start
LH: loop header
LB: loop body
LE: loop exit
PB: predicated region body
PF: predicated region fallthrough
CT: control target
= control target key end

     0   :  { %6 = vsyncpa [#allocation3], 0  ;;  %s508_s0 = inlined_call_operand.hbm [shape: f32[2,4,256], index: 0, kind: input, shape index: {}]   ;;  %s509_s1 = inlined_call_operand.vmem [shape: f32[2,4,1], index: 1, kind: output, shape index: {}]  }
   0x1   :  { %8 = vsyncpa [#allocation3 + $0x1], 0  ;;  %s408_s6 = smov 0   ;;  %s410_s7 = smov 0  }
   0x2   :  { %s412_s8 = smov 0   ;;  %s414_s9 = smov 0  }
   0x3   :  { %s416_s10 = smov 0   ;;  %s418_s11 = smov 0  }
   0x4 LB: > { %s246_s12 = sadd.s32 4294967295, %s394_s11   ;;  %s26_s13 = sadd.s32 1, %s390_s10  ;;  %s394_s11 = sphi %s418_s11, %s14_s11   ;;  %s390_s10 = sphi %s416_s10, %s517_s10   ;;  %s386_s9 = sphi %s414_s9, %s516_s9   ;;  %s382_s8 = sphi %s412_s8, %s515_s8   ;;  %s378_s7 = sphi %s410_s7, %s514_s7   ;;  %s374_s6 = sphi %s408_s6, %s513_s6  }
   0x5   : > { %p28_p0 = scmp.ge.s32.totalorder %s26_s13, 2  ;;  %s35_s14 = sadd.s32 1, %s382_s8 }
   0x6   : > { %p42_p1 = scmp.ne.s32.totalorder %s382_s8, %s378_s7  ;;  %p43_p2 = scmp.eq.s32.totalorder %s394_s11, 0 }
   0x7   : > { %s519_s13 = smov (%p28_p0, %s26_s13), 0  ;;  %p48_p4 = scmp.ne.s32.totalorder %s378_s7, %s374_s6 }
   0x8   : > { %p444_p3 = por %p43_p2, %p42_p1  ;;  %s30_s16 = ssub.s32 %s390_s10, %s519_s13 }
   0x9   : > { %p49_p5 = scmp.eq.s32.totalorder %s246_s12, 0  ;;  %p33_p6 = scmp.eq.s32.totalorder %s30_s16, 0 }
   0xa   : > { %p265_p8 = scmp.lt.s32.totalorder %s394_s11, 2  ;;  %s98_s19 = sand.u32 1, %s382_s8  }
   0xb   : > { %p451_p7 = por %p49_p5, %p48_p4  ;;  %s258_s20 = sshll.u32 %s390_s10, 7 }
   0xc   : > { %s457_s18 = scalar_select %p33_p6, %s382_s8, %s35_s14  }
   0xd   : > { %s250_s21 = sshll.u32 %s98_s19, 3  ;;  %s110_s24 = scalar_lea.hbm %s508_s0, %s258_s20 }
   0xe   : > { %s102_s25 = scalar_lea.vmem [#allocation2], %s250_s21  ;;  %p466_p9 = pnand %p265_p8, %p444_p3 }
   0xf   : > { %s112_s26 = sshll.u32 %s102_s25, 4  ;;  %p253_p10 = scmp.ge.s32.totalorder %s394_s11, 1  ;;  %s113_s26 = int_to_ptr.vmem [resolvable:$true] %s112_s26 }
  0x10   : > { %p117_p11 = scmp.lt.s32.totalorder %s394_s11, 3  ;;  %s99_s28 = scalar_lea.sflag [#allocation3], %s98_s19 }
  0x11   : > { %p318_p12 = pneg %p466_p9  ;;  %s329_s29 = scalar_lea.vmem %s113_s26, 128 }
  0x12   : > { %p330_p13 = scmp.ne.s32.totalorder %s113_s26, %s329_s29  ;;  %s396_s30 = smov [#allocation2]  }
  0x13   : > { %s334_s2 = sshll.u32 %s396_s30, 4  ;;  %s335_s2 = int_to_ptr.vmem [resolvable:$false] %s334_s2 }
  0x14   : > { %p332_p0 = pnand %p330_p13, %p318_p12  ;;  %s336_s3 = scalar_lea.vmem %s335_s2, 256 }
  0x15   : > { %p337_p2 = scmp.lt.s32.totalorder %s113_s26, %s335_s2  ;;  %p338_p3 = scmp.lt.s32.totalorder %s336_s3, %s329_s29 }
  0x16   : > { %p333_p1 = pneg %p332_p0 }
  0x17   : > { %p339_p4 = por %p338_p3, %p337_p2 }
  0x19   : > { %p340_p5 = pnand %p339_p4, %p333_p1 }
  0x1b   : > { %343 = shalt.err (!%p340_p5)
}
  0x1c   : > { %264 = dma.hbm_to_vmem [thread:$0]  (!%p466_p9), %s110_s24, 128, %s113_s26, %s99_s28  }
  0x1d   : > { %p118_p6 = pnand %p253_p10, %p117_p11 }
  0x1e   : > { %s123_s4 = sand.u32 (!%p118_p6), 1, %s378_s7  }
  0x1f   : > { %121 = sbr.rel (%p118_p6) target bundleno = 184 (0xb8), region = 24  ;;  %s254_s5 = sshll.u32 (!%p118_p6), %s123_s4, 3 }
  0x20   : > { %s124_s6 = scalar_lea.sflag (!%p118_p6), [#allocation3], %s123_s4  ;;  %s127_s12 = scalar_lea.vmem (!%p118_p6), [#allocation2], %s254_s5 }
  0x24   : > { %369 = dma.done.wait (%p451_p7), %s124_s6, 128  }
  0x25   : > { %371 = vsyncadd (%p451_p7), %s124_s6, 4294967168  ;;  %p146_p8 = scmp.lt.s32.totalorder %s386_s9, 1  ;;  %vm154_vm0 = vcmask 3072   ;;  %vm161_vm1 = vcmask 1043456   ;;  %v397_v0 = vmov 0.0   ;;  %v156_v1 = vld [vmem:[%s127_s12] sm:$0xff] }
  0x26   : > { %v159_v2 = vcombine.high %v156_v1, %v156_v1  ;;  %v162_v3 = vsel %vm161_vm1, %v156_v1, 0.0 }
  0x27   : > { %s521_s9 = smov (!%p146_p8, %s386_s9), 1 }
  0x28   : > { %s255_s14 = sshll.u32 %s521_s9, 2  ;;  %v163_v4 = vsel %vm161_vm1, %v159_v2, 0.0 }
  0x29   : > { %s149_s19 = scalar_lea.vmem %s509_s1, %s255_s14  ;;  %v164_v5 = vadd.f32 %v163_v4, %v162_v3 }
  0x2a   : > { %155 = vst.msk [vmem:[%s149_s19] sm:$0xf] %vm154_vm0, %v397_v0 }
  0x2b   : > { %165 = vadd.xlane.f32.xlu0 %v164_v5 }
  0x31   : > { %v157_v6 = vld [vmem:[%s149_s19] sm:$0xf] }
  0xb4   : > { %v166_v7 = vpop.xlane.xlu0 %165 }
  0xb5   : > { %v167_v8 = vadd.f32 %v166_v7, %v157_v6 }
  0xb7   : > { %169 = vst.msk [vmem:[%s149_s19] sm:$0xf] %vm154_vm0, %v167_v8 }
  0xb8 PF: > { %s14_s11 = sadd.s32 1, %s394_s11   ;;  %s513_s6 = smov %s378_s7 }
  0xb9   : > { %p11_p7 = scmp.ge.s32.totalorder %s14_s11, 4   ;;  %s514_s7 = smov %s382_s8 }
  0xba   : > { %s515_s8 = smov %s457_s18  ;;  %s516_s9 = smov %s390_s10 }
  0xbb   : > { %s517_s10 = smov %s519_s13  ;;  %13 = sbr.rel (!%p11_p7) target bundleno = 4 (0x4), region = 68 }
  0xc0   :  { %189 = vsyncpa [#allocation3], 1 }
  0xc1   :  { %191 = vsyncpa [#allocation3 + $0x1], 1 }

</bundles_post_ra>
